<compile_context>
chip_gen: v7x
topology: tpu7x:2x2x1
jax: 0.10.0
libtpu: 0.0.40
codegen_flags: <defaults>
</compile_context>

<pallas_src>
import functools

import jax
import jax.numpy as jnp
from jax import lax
from jax.experimental import pallas as pl
from jax.experimental.pallas import tpu as pltpu


def convblock_kernel(x_ref, w1_ref, b1_ref, w2_ref, b2_ref, mask_ref, sel_ref,
                     o_ref, p2_ref, *, h, w):
    wp2 = w + 2                  # padded frame width
    L = h * wp2                  # flat length covering the h interior rows
    base = 2 * wp2               # flat offset of the first interior row
    c_out = p2_ref.shape[0]
    starts = [(ky + 1) * wp2 + kx - 1 for ky in range(3) for kx in range(3)]

    # ---- conv1: 3x3 pad=1 + bias + ReLU as ONE im2col matmul on the MXU ----
    taps1 = jnp.concatenate([x_ref[0, :, s:s + L] for s in starts], axis=0)   # (9*c_in, L)
    y1 = jnp.dot(w1_ref[...], taps1, preferred_element_type=jnp.float32)      # (c_out, L)
    h1 = jnp.maximum(y1 + b1_ref[...], 0.0) * mask_ref[...]                   # zero pad cols

    # conv2's zero-padded input frame: only the small border rows need zeroing
    # (re-done every step; the interior incl. pad columns is fully rewritten).
    zero_border = jnp.zeros((c_out, base), jnp.float32)
    p2_ref[:, :base] = zero_border
    p2_ref[:, base + L:] = zero_border
    p2_ref[:, base:base + L] = h1

    # ---- conv2: 3x3 pad=1 + bias + ReLU as ONE im2col matmul ----
    taps2 = jnp.concatenate([p2_ref[:, s:s + L] for s in starts], axis=0)     # (9*c_out, L)
    y2 = jnp.dot(w2_ref[...], taps2, preferred_element_type=jnp.float32)      # (c_out, L)
    h2 = jnp.maximum(y2 + b2_ref[...], 0.0)

    # ---- maxpool 2x2 stride 2 ----
    hmax = jnp.maximum(h2[:, :L - 1], h2[:, 1:])                # cols c, c+1
    vmax = jnp.maximum(hmax[:, :L - 1 - wp2], hmax[:, wp2:])    # rows r, r+1
    # stride-2 decimation in both dims via a constant one-hot matmul (MXU).
    o_ref[0] = jnp.dot(vmax, sel_ref[...], preferred_element_type=jnp.float32)


def convblock_forward(x_nchw, w1_oihw, b1, w2_oihw, b2):
    """ConvBlock.forward: relu(conv1) -> relu(conv2) -> maxpool2x2."""
    n, c_in, h, w = x_nchw.shape
    c_out = w1_oihw.shape[0]
    assert h % 2 == 0 and w % 2 == 0, "even H/W required (MaxPool2d(2))"
    hp, wp = h // 2, w // 2
    wp2 = w + 2
    ftot = (h + 4) * wp2
    L = h * wp2
    m = hp * wp
    lq = L - 1 - wp2

    # --- layout glue: zero-pad into a (H+4, W+2) frame and flatten spatial ---
    x_flat = jnp.pad(x_nchw, ((0, 0), (0, 0), (2, 2), (1, 1))).reshape(n, c_in, ftot)

    # --- weights (O,I,3,3) -> (O, 9*I); K ordered (ky, kx, ci) to match im2col ---
    w1_flat = jnp.transpose(w1_oihw, (0, 2, 3, 1)).reshape(c_out, 9 * c_in)
    w2_flat = jnp.transpose(w2_oihw, (0, 2, 3, 1)).reshape(c_out, 9 * c_out)
    b1c = b1.reshape(c_out, 1)
    b2c = b2.reshape(c_out, 1)

    # --- constant masks (pure layout prep, no compute on data) ---
    cc = jnp.arange(L) % wp2
    colmask = ((cc >= 1) & (cc <= w)).astype(jnp.float32).reshape(1, L)
    mi = jnp.arange(m)
    qsel = 2 * (mi // wp) * wp2 + 2 * (mi % wp) + 1            # window anchor per output px
    sel = (jnp.arange(lq)[:, None] == qsel[None, :]).astype(jnp.float32)   # (lq, m) one-hot

    kernel = functools.partial(convblock_kernel, h=h, w=w)

    y_flat = pl.pallas_call(
        kernel,
        out_shape=jax.ShapeDtypeStruct((n, c_out, m), jnp.float32),
        grid_spec=pltpu.PrefetchScalarGridSpec(
            num_scalar_prefetch=0,
            grid=(n,),
            in_specs=[
                pl.BlockSpec((1, c_in, ftot), lambda i: (i, 0, 0)),
                pl.BlockSpec((c_out, 9 * c_in), lambda i: (0, 0)),
                pl.BlockSpec((c_out, 1), lambda i: (0, 0)),
                pl.BlockSpec((c_out, 9 * c_out), lambda i: (0, 0)),
                pl.BlockSpec((c_out, 1), lambda i: (0, 0)),
                pl.BlockSpec((1, L), lambda i: (0, 0)),
                pl.BlockSpec((lq, m), lambda i: (0, 0)),
            ],
            out_specs=pl.BlockSpec((1, c_out, m), lambda i: (i, 0, 0)),
            scratch_shapes=[
                pltpu.VMEM((c_out, ftot), jnp.float32),   # zero-bordered conv1-output frame
            ],
        ),
        compiler_params=pltpu.CompilerParams(dimension_semantics=("parallel",)),
    )(x_flat, w1_flat, b1c, w2_flat, b2c, colmask, sel)

    # --- layout glue: (N, Cout, Hp*Wp) is already NCHW-ordered; just reshape ---
    return y_flat.reshape(n, c_out, hp, wp)


def reference_forward(x_nchw, w1_oihw, b1, w2_oihw, b2):
    """Pure-JAX reference matching the PyTorch ConvBlock."""
    dn = ("NCHW", "OIHW", "NCHW")
    y = lax.conv_general_dilated(x_nchw, w1_oihw, (1, 1), ((1, 1), (1, 1)),
                                 dimension_numbers=dn, precision=lax.Precision.HIGHEST)
    y = jnp.maximum(y + b1[None, :, None, None], 0.0)
    y = lax.conv_general_dilated(y, w2_oihw, (1, 1), ((1, 1), (1, 1)),
                                 dimension_numbers=dn, precision=lax.Precision.HIGHEST)
    y = jnp.maximum(y + b2[None, :, None, None], 0.0)
    return lax.reduce_window(y, -jnp.inf, lax.max,
                             window_dimensions=(1, 1, 2, 2),
                             window_strides=(1, 1, 2, 2), padding="VALID")


if __name__ == "__main__":
    # ConvBlock(in_channels=4, out_channels=8)
    N, C_IN, H, W = 2, 4, 16, 16
    C_OUT = 8

    key = jax.random.PRNGKey(0)
    kx, kw1, kb1, kw2, kb2 = jax.random.split(key, 5)
    x = jax.random.normal(kx, (N, C_IN, H, W), dtype=jnp.float32)
    w1 = 0.1 * jax.random.normal(kw1, (C_OUT, C_IN, 3, 3), dtype=jnp.float32)
    b1 = 0.1 * jax.random.normal(kb1, (C_OUT,), dtype=jnp.float32)
    w2 = 0.1 * jax.random.normal(kw2, (C_OUT, C_OUT, 3, 3), dtype=jnp.float32)
    b2 = 0.1 * jax.random.normal(kb2, (C_OUT,), dtype=jnp.float32)

    y = jax.block_until_ready(convblock_forward(x, w1, b1, w2, b2))
    y_ref = jax.block_until_ready(reference_forward(x, w1, b1, w2, b2))

    assert y.shape == (N, C_OUT, H // 2, W // 2), y.shape
    if not jnp.allclose(y, y_ref, atol=2e-4, rtol=2e-4):
        raise AssertionError(
            f"mismatch vs reference, max abs err = {jnp.max(jnp.abs(y - y_ref))}")
    print("KERNEL_OK")
</pallas_src>

<mosaic_0001>
module attributes {stable_mosaic.version = 11 : i64} {
  func.func @convblock_kernel(%arg0: i32, %arg1: memref<1x4x360xf32, #tpu.memory_space<vmem>>, %arg2: memref<8x36xf32, #tpu.memory_space<vmem>>, %arg3: memref<8x1xf32, #tpu.memory_space<vmem>>, %arg4: memref<8x72xf32, #tpu.memory_space<vmem>>, %arg5: memref<8x1xf32, #tpu.memory_space<vmem>>, %arg6: memref<1x288xf32, #tpu.memory_space<vmem>>, %arg7: memref<269x64xf32, #tpu.memory_space<vmem>>, %arg8: memref<1x8x64xf32, #tpu.memory_space<vmem>>, %arg9: memref<8x360xf32, #tpu.memory_space<vmem>>) attributes {dimension_semantics = [#tpu.dimension_semantics<parallel>], iteration_bounds = array<i64: 2>, scalar_prefetch = 0 : i64, scratch_operands = 1 : i64, tpu.core_type = #tpu.core_type<tc>, window_params = [{transform_indices = @transform_0, window_bounds = array<i64: 1, 4, 360>}, {pipeline_mode = #tpu.pipeline_mode<synchronous>, transform_indices = @transform_1, window_bounds = array<i64: 8, 36>}, {pipeline_mode = #tpu.pipeline_mode<synchronous>, transform_indices = @transform_2, window_bounds = array<i64: 8, 1>}, {pipeline_mode = #tpu.pipeline_mode<synchronous>, transform_indices = @transform_3, window_bounds = array<i64: 8, 72>}, {pipeline_mode = #tpu.pipeline_mode<synchronous>, transform_indices = @transform_4, window_bounds = array<i64: 8, 1>}, {pipeline_mode = #tpu.pipeline_mode<synchronous>, transform_indices = @transform_5, window_bounds = array<i64: 1, 288>}, {pipeline_mode = #tpu.pipeline_mode<synchronous>, transform_indices = @transform_6, window_bounds = array<i64: 269, 64>}, {transform_indices = @transform_7, window_bounds = array<i64: 1, 8, 64>}]} {
    %c0 = arith.constant 0 : index
    %c0_0 = arith.constant 0 : index
    %c17 = arith.constant 17 : index
    %0 = vector.load %arg1[%c0, %c0_0, %c17] : memref<1x4x360xf32, #tpu.memory_space<vmem>>, vector<1x4x288xf32>
    %1 = vector.shape_cast %0 : vector<1x4x288xf32> to vector<4x288xf32>
    %c0_1 = arith.constant 0 : index
    %c0_2 = arith.constant 0 : index
    %c18 = arith.constant 18 : index
    %2 = vector.load %arg1[%c0_1, %c0_2, %c18] : memref<1x4x360xf32, #tpu.memory_space<vmem>>, vector<1x4x288xf32>
    %3 = vector.shape_cast %2 : vector<1x4x288xf32> to vector<4x288xf32>
    %c0_3 = arith.constant 0 : index
    %c0_4 = arith.constant 0 : index
    %c19 = arith.constant 19 : index
    %4 = vector.load %arg1[%c0_3, %c0_4, %c19] : memref<1x4x360xf32, #tpu.memory_space<vmem>>, vector<1x4x288xf32>
    %5 = vector.shape_cast %4 : vector<1x4x288xf32> to vector<4x288xf32>
    %c0_5 = arith.constant 0 : index
    %c0_6 = arith.constant 0 : index
    %c35 = arith.constant 35 : index
    %6 = vector.load %arg1[%c0_5, %c0_6, %c35] : memref<1x4x360xf32, #tpu.memory_space<vmem>>, vector<1x4x288xf32>
    %7 = vector.shape_cast %6 : vector<1x4x288xf32> to vector<4x288xf32>
    %c0_7 = arith.constant 0 : index
    %c0_8 = arith.constant 0 : index
    %c36 = arith.constant 36 : index
    %8 = vector.load %arg1[%c0_7, %c0_8, %c36] : memref<1x4x360xf32, #tpu.memory_space<vmem>>, vector<1x4x288xf32>
    %9 = vector.shape_cast %8 : vector<1x4x288xf32> to vector<4x288xf32>
    %c0_9 = arith.constant 0 : index
    %c0_10 = arith.constant 0 : index
    %c37 = arith.constant 37 : index
    %10 = vector.load %arg1[%c0_9, %c0_10, %c37] : memref<1x4x360xf32, #tpu.memory_space<vmem>>, vector<1x4x288xf32>
    %11 = vector.shape_cast %10 : vector<1x4x288xf32> to vector<4x288xf32>
    %c0_11 = arith.constant 0 : index
    %c0_12 = arith.constant 0 : index
    %c53 = arith.constant 53 : index
    %12 = vector.load %arg1[%c0_11, %c0_12, %c53] : memref<1x4x360xf32, #tpu.memory_space<vmem>>, vector<1x4x288xf32>
    %13 = vector.shape_cast %12 : vector<1x4x288xf32> to vector<4x288xf32>
    %c0_13 = arith.constant 0 : index
    %c0_14 = arith.constant 0 : index
    %c54 = arith.constant 54 : index
    %14 = vector.load %arg1[%c0_13, %c0_14, %c54] : memref<1x4x360xf32, #tpu.memory_space<vmem>>, vector<1x4x288xf32>
    %15 = vector.shape_cast %14 : vector<1x4x288xf32> to vector<4x288xf32>
    %c0_15 = arith.constant 0 : index
    %c0_16 = arith.constant 0 : index
    %c55 = arith.constant 55 : index
    %16 = vector.load %arg1[%c0_15, %c0_16, %c55] : memref<1x4x360xf32, #tpu.memory_space<vmem>>, vector<1x4x288xf32>
    %17 = vector.shape_cast %16 : vector<1x4x288xf32> to vector<4x288xf32>
    %18 = tpu.concatenate %1, %3, %5, %7, %9, %11, %13, %15, %17 in 0 : vector<4x288xf32>, vector<4x288xf32>, vector<4x288xf32>, vector<4x288xf32>, vector<4x288xf32>, vector<4x288xf32>, vector<4x288xf32>, vector<4x288xf32>, vector<4x288xf32> -> vector<36x288xf32>
    %c0_17 = arith.constant 0 : index
    %c0_18 = arith.constant 0 : index
    %19 = vector.load %arg2[%c0_17, %c0_18] : memref<8x36xf32, #tpu.memory_space<vmem>>, vector<8x36xf32>
    %cst = arith.constant dense<0.000000e+00> : vector<8x288xf32>
    %20 = tpu.matmul %19, %18, %cst {dimension_numbers = #tpu.dot_dimension_numbers<[1], [0], [0], [1], [0, 0, 1, 1], [], []>} : vector<8x36xf32>, vector<36x288xf32>, vector<8x288xf32> -> vector<8x288xf32>
    %c0_19 = arith.constant 0 : index
    %c0_20 = arith.constant 0 : index
    %21 = vector.load %arg3[%c0_19, %c0_20] : memref<8x1xf32, #tpu.memory_space<vmem>>, vector<8x1xf32>
    %22 = vector.broadcast %21 : vector<8x1xf32> to vector<8x288xf32>
    %23 = arith.addf %20, %22 : vector<8x288xf32>
    %cst_21 = arith.constant 0.000000e+00 : f32
    %24 = vector.broadcast %cst_21 : f32 to vector<8x288xf32>
    %25 = arith.maximumf %23, %24 : vector<8x288xf32>
    %c0_22 = arith.constant 0 : index
    %c0_23 = arith.constant 0 : index
    %26 = vector.load %arg6[%c0_22, %c0_23] : memref<1x288xf32, #tpu.memory_space<vmem>>, vector<1x288xf32>
    %27 = vector.broadcast %26 : vector<1x288xf32> to vector<8x288xf32>
    %28 = arith.mulf %25, %27 : vector<8x288xf32>
    %cst_24 = arith.constant 0.000000e+00 : f32
    %29 = vector.broadcast %cst_24 : f32 to vector<8x36xf32>
    %c0_25 = arith.constant 0 : index
    %c0_26 = arith.constant 0 : index
    %30 = vector.load %arg9[%c0_25, %c0_26] : memref<8x360xf32, #tpu.memory_space<vmem>>, vector<8x36xf32>
    tpu.vector_store %arg9[%c0_25, %c0_26], %29 {strides = array<i32>} : memref<8x360xf32, #tpu.memory_space<vmem>>, vector<8x36xf32>,
    %c0_27 = arith.constant 0 : index
    %c324 = arith.constant 324 : index
    %31 = vector.load %arg9[%c0_27, %c324] : memref<8x360xf32, #tpu.memory_space<vmem>>, vector<8x36xf32>
    tpu.vector_store %arg9[%c0_27, %c324], %29 {strides = array<i32>} : memref<8x360xf32, #tpu.memory_space<vmem>>, vector<8x36xf32>,
    %c0_28 = arith.constant 0 : index
    %c36_29 = arith.constant 36 : index
    %32 = vector.load %arg9[%c0_28, %c36_29] : memref<8x360xf32, #tpu.memory_space<vmem>>, vector<8x288xf32>
    tpu.vector_store %arg9[%c0_28, %c36_29], %28 {strides = array<i32>} : memref<8x360xf32, #tpu.memory_space<vmem>>, vector<8x288xf32>,
    %c0_30 = arith.constant 0 : index
    %c17_31 = arith.constant 17 : index
    %33 = vector.load %arg9[%c0_30, %c17_31] : memref<8x360xf32, #tpu.memory_space<vmem>>, vector<8x288xf32>
    %c0_32 = arith.constant 0 : index
    %c18_33 = arith.constant 18 : index
    %34 = vector.load %arg9[%c0_32, %c18_33] : memref<8x360xf32, #tpu.memory_space<vmem>>, vector<8x288xf32>
    %c0_34 = arith.constant 0 : index
    %c19_35 = arith.constant 19 : index
    %35 = vector.load %arg9[%c0_34, %c19_35] : memref<8x360xf32, #tpu.memory_space<vmem>>, vector<8x288xf32>
    %c0_36 = arith.constant 0 : index
    %c35_37 = arith.constant 35 : index
    %36 = vector.load %arg9[%c0_36, %c35_37] : memref<8x360xf32, #tpu.memory_space<vmem>>, vector<8x288xf32>
    %c0_38 = arith.constant 0 : index
    %c36_39 = arith.constant 36 : index
    %37 = vector.load %arg9[%c0_38, %c36_39] : memref<8x360xf32, #tpu.memory_space<vmem>>, vector<8x288xf32>
    %c0_40 = arith.constant 0 : index
    %c37_41 = arith.constant 37 : index
    %38 = vector.load %arg9[%c0_40, %c37_41] : memref<8x360xf32, #tpu.memory_space<vmem>>, vector<8x288xf32>
    %c0_42 = arith.constant 0 : index
    %c53_43 = arith.constant 53 : index
    %39 = vector.load %arg9[%c0_42, %c53_43] : memref<8x360xf32, #tpu.memory_space<vmem>>, vector<8x288xf32>
    %c0_44 = arith.constant 0 : index
    %c54_45 = arith.constant 54 : index
    %40 = vector.load %arg9[%c0_44, %c54_45] : memref<8x360xf32, #tpu.memory_space<vmem>>, vector<8x288xf32>
    %c0_46 = arith.constant 0 : index
    %c55_47 = arith.constant 55 : index
    %41 = vector.load %arg9[%c0_46, %c55_47] : memref<8x360xf32, #tpu.memory_space<vmem>>, vector<8x288xf32>
    %42 = tpu.concatenate %33, %34, %35, %36, %37, %38, %39, %40, %41 in 0 : vector<8x288xf32>, vector<8x288xf32>, vector<8x288xf32>, vector<8x288xf32>, vector<8x288xf32>, vector<8x288xf32>, vector<8x288xf32>, vector<8x288xf32>, vector<8x288xf32> -> vector<72x288xf32>
    %c0_48 = arith.constant 0 : index
    %c0_49 = arith.constant 0 : index
    %43 = vector.load %arg4[%c0_48, %c0_49] : memref<8x72xf32, #tpu.memory_space<vmem>>, vector<8x72xf32>
    %cst_50 = arith.constant dense<0.000000e+00> : vector<8x288xf32>
    %44 = tpu.matmul %43, %42, %cst_50 {dimension_numbers = #tpu.dot_dimension_numbers<[1], [0], [0], [1], [0, 0, 1, 1], [], []>} : vector<8x72xf32>, vector<72x288xf32>, vector<8x288xf32> -> vector<8x288xf32>
    %c0_51 = arith.constant 0 : index
    %c0_52 = arith.constant 0 : index
    %45 = vector.load %arg5[%c0_51, %c0_52] : memref<8x1xf32, #tpu.memory_space<vmem>>, vector<8x1xf32>
    %46 = vector.broadcast %45 : vector<8x1xf32> to vector<8x288xf32>
    %47 = arith.addf %44, %46 : vector<8x288xf32>
    %cst_53 = arith.constant 0.000000e+00 : f32
    %48 = vector.broadcast %cst_53 : f32 to vector<8x288xf32>
    %49 = arith.maximumf %47, %48 : vector<8x288xf32>
    %50 = vector.extract_strided_slice %49 {offsets = [0, 0], sizes = [8, 287], strides = [1, 1]} : vector<8x288xf32> to vector<8x287xf32>
    %51 = vector.extract_strided_slice %49 {offsets = [0, 1], sizes = [8, 287], strides = [1, 1]} : vector<8x288xf32> to vector<8x287xf32>
    %52 = arith.maximumf %50, %51 : vector<8x287xf32>
    %53 = vector.extract_strided_slice %52 {offsets = [0, 0], sizes = [8, 269], strides = [1, 1]} : vector<8x287xf32> to vector<8x269xf32>
    %54 = vector.extract_strided_slice %52 {offsets = [0, 18], sizes = [8, 269], strides = [1, 1]} : vector<8x287xf32> to vector<8x269xf32>
    %55 = arith.maximumf %53, %54 : vector<8x269xf32>
    %c0_54 = arith.constant 0 : index
    %c0_55 = arith.constant 0 : index
    %56 = vector.load %arg7[%c0_54, %c0_55] : memref<269x64xf32, #tpu.memory_space<vmem>>, vector<269x64xf32>
    %cst_56 = arith.constant dense<0.000000e+00> : vector<8x64xf32>
    %57 = tpu.matmul %55, %56, %cst_56 {dimension_numbers = #tpu.dot_dimension_numbers<[1], [0], [0], [1], [0, 0, 1, 1], [], []>} : vector<8x269xf32>, vector<269x64xf32>, vector<8x64xf32> -> vector<8x64xf32>
    %c0_57 = arith.constant 0 : index
    %c0_58 = arith.constant 0 : index
    %c0_59 = arith.constant 0 : index
    %58 = vector.load %arg8[%c0_57, %c0_58, %c0_59] : memref<1x8x64xf32, #tpu.memory_space<vmem>>, vector<1x8x64xf32>
    %59 = vector.shape_cast %58 : vector<1x8x64xf32> to vector<8x64xf32>
    %60 = vector.shape_cast %57 : vector<8x64xf32> to vector<1x8x64xf32>
    tpu.vector_store %arg8[%c0_57, %c0_58, %c0_59], %60 {strides = array<i32>} : memref<1x8x64xf32, #tpu.memory_space<vmem>>, vector<1x8x64xf32>,
    return
  }
  func.func @transform_0(%arg0: i32) -> (i32, i32, i32) {
    %c0_i32 = arith.constant 0 : i32
    %c0_i32_0 = arith.constant 0 : i32
    %c0_i32_1 = arith.constant 0 : i32
    return %arg0, %c0_i32, %c0_i32_0 : i32, i32, i32
  }
  func.func @transform_1(%arg0: i32) -> (i32, i32) {
    %c0_i32 = arith.constant 0 : i32
    %c0_i32_0 = arith.constant 0 : i32
    %c0_i32_1 = arith.constant 0 : i32
    return %c0_i32, %c0_i32_0 : i32, i32
  }
  func.func @transform_2(%arg0: i32) -> (i32, i32) {
    %c0_i32 = arith.constant 0 : i32
    %c0_i32_0 = arith.constant 0 : i32
    %c0_i32_1 = arith.constant 0 : i32
    return %c0_i32, %c0_i32_0 : i32, i32
  }
  func.func @transform_3(%arg0: i32) -> (i32, i32) {
    %c0_i32 = arith.constant 0 : i32
    %c0_i32_0 = arith.constant 0 : i32
    %c0_i32_1 = arith.constant 0 : i32
    return %c0_i32, %c0_i32_0 : i32, i32
  }
  func.func @transform_4(%arg0: i32) -> (i32, i32) {
    %c0_i32 = arith.constant 0 : i32
    %c0_i32_0 = arith.constant 0 : i32
    %c0_i32_1 = arith.constant 0 : i32
    return %c0_i32, %c0_i32_0 : i32, i32
  }
  func.func @transform_5(%arg0: i32) -> (i32, i32) {
    %c0_i32 = arith.constant 0 : i32
    %c0_i32_0 = arith.constant 0 : i32
    %c0_i32_1 = arith.constant 0 : i32
    return %c0_i32, %c0_i32_0 : i32, i32
  }
  func.func @transform_6(%arg0: i32) -> (i32, i32) {
    %c0_i32 = arith.constant 0 : i32
    %c0_i32_0 = arith.constant 0 : i32
    %c0_i32_1 = arith.constant 0 : i32
    return %c0_i32, %c0_i32_0 : i32, i32
  }
  func.func @transform_7(%arg0: i32) -> (i32, i32, i32) {
    %c0_i32 = arith.constant 0 : i32
    %c0_i32_0 = arith.constant 0 : i32
    %c0_i32_1 = arith.constant 0 : i32
    return %arg0, %c0_i32, %c0_i32_0 : i32, i32, i32
  }
}

</mosaic_0001>

<bundles_post_ra>
// kernel: tpu_custom_call.1
= control target key start
LH: loop header
LB: loop body
LE: loop exit
PB: predicated region body
PF: predicated region fallthrough
CT: control target
= control target key end

     0   :  { %12 = vsyncpa [#allocation4], 0  ;;  %s2232_s0 = inlined_call_operand.vmem [shape: f32[2,4,360], index: 0, kind: input, shape index: {}]   ;;  %s2233_s1 = inlined_call_operand.vmem [shape: f32[8,36], index: 1, kind: input, shape index: {}]   ;;  %s2234_s2 = inlined_call_operand.vmem [shape: f32[8,1], index: 2, kind: input, shape index: {}]   ;;  %s2235_s3 = inlined_call_operand.vmem [shape: f32[8,72], index: 3, kind: input, shape index: {}]   ;;  %s2236_s4 = inlined_call_operand.vmem [shape: f32[8,1], index: 4, kind: input, shape index: {}]   ;;  %s2237_s5 = inlined_call_operand.vmem [shape: f32[1,288], index: 5, kind: input, shape index: {}]   ;;  %s2238_s6 = inlined_call_operand.vmem [shape: f32[269,64], index: 6, kind: input, shape index: {}]   ;;  %s2239_s7 = inlined_call_operand.hbm [shape: f32[2,8,64], index: 7, kind: output, shape index: {}]  }
   0x1   :  { %14 = vsyncpa [#allocation4 + $0x1], 0  ;;  %s1816_s24 = smov 0   ;;  %s1818_s25 = smov 0  }
   0x2   :  { %s1820_s26 = smov 0   ;;  %s1822_s27 = smov 0  }
   0x3 LB: > { %s1837_s28 = sadd.s32 4294967295, %s1758_s27   ;;  %s1274_s29 = sadd.s32 4294967294, %s1758_s27   ;;  %s1758_s27 = sphi %s1822_s27, %s2245_s27   ;;  %s1754_s26 = sphi %s1820_s26, %s2244_s26   ;;  %s1750_s25 = sphi %s1818_s25, %s2243_s25   ;;  %s1746_s24 = sphi %s1816_s24, %s2242_s24  }
   0x4   : > { %s1841_s30 = sadd.s32 1, %s1758_s27   ;;  %s179_s8 = sadd.s32 1, %s1754_s26 }
   0x5   : > { %s176_s9 = ssub.s32 %s1758_s27, %s1841_s30  ;;  %p189_p0 = scmp.ne.s32.totalorder %s1754_s26, %s1750_s25 }
   0x6   : > { %p177_p1 = scmp.eq.s32.totalorder %s176_s9, 0  ;;  %p190_p2 = scmp.eq.s32.totalorder %s1837_s28, 1 }
   0x7   : > { %p195_p3 = scmp.ne.s32.totalorder %s1750_s25, %s1746_s24  ;;  %p196_p4 = scmp.eq.s32.totalorder %s1274_s29, 1 }
   0x8   : > { %s1852_s10 = scalar_select %p177_p1, %s1754_s26, %s179_s8  }
   0x9   : > { %p1854_p5 = por %p190_p2, %p189_p0  ;;  %p1858_p6 = por %p196_p4, %p195_p3 }
   0xa   : > { %p1277_p7 = scmp.ge.s32.totalorder %s1758_s27, 1  ;;  %p240_p8 = scmp.lt.s32.totalorder %s1758_s27, 3 }
   0xc   : > { %p241_p9 = pnand %p1277_p7, %p240_p8 }
   0xd   : > { %p272_p10 = scmp.lt.s32.totalorder (!%p241_p9), %s1837_s28, 1  ;;  %s1760_s18 = smov (!%p241_p9), 126   ;;  %vm291_vm0 = vcmask (!%p241_p9), 1039360   ;;  %vm378_vm1 = vcmask (!%p241_p9), 1043456   ;;  %vm315_vm2 = vcmask (!%p241_p9), 900096   ;;  %vm303_vm3 = vcmask (!%p241_p9), 1031168  }
   0xe   : > { %244 = sbr.rel (%p241_p9) target bundleno = 1615 (0x64f), region = 48  ;;  %s1761_s19 = smov (!%p241_p9), 110   ;;  %vm327_vm4 = vcmask (!%p241_p9), 891904   ;;  %vm339_vm5 = vcmask (!%p241_p9), 883712   ;;  %vm351_vm6 = vcmask (!%p241_p9), 752640   ;;  %vm363_vm7 = vcmask (!%p241_p9), 744448  }
   0xf   : > { %s1762_s20 = smov (!%p241_p9), 127   ;;  %s1763_s21 = smov (!%p241_p9), 109   ;;  %vm463_vm8 = vcmask (!%p241_p9), 293888   ;;  %vm375_vm9 = vcmask (!%p241_p9), 736256   ;;  %vm440_vm10 = vcmask (!%p241_p9), 908288   ;;  %vm1772_vm11 = vmmov (!%p241_p9), 0  }
  0x10   : > { %s1764_s22 = smov (!%p241_p9), 108   ;;  %s1765_s23 = smov (!%p241_p9), 92   ;;  %vm638_vm12 = vcmask (!%p241_p9), 851488   ;;  %vm654_vm13 = vcmask (!%p241_p9), 1047840   ;;  %vm657_vm14 = vcmask (!%p241_p9), 556032   ;;  %vm835_vm15 = vcmask (!%p241_p9), 588800  }
  0x11   : > { %s1766_s29 = smov (!%p241_p9), 91   ;;  %s1767_s8 = smov (!%p241_p9), 90  }
  0x12   : > { %s1768_s9 = smov (!%p241_p9), 111  }
  0x15   : > { %s273_s13 = scalar_select %p272_p10, %s1837_s28, 1 }
  0x17   : > { %s1466_s14 = smul.u32 12, %s273_s13  ;;  %s1290_s13 = sshll.u32 %s1837_s28, 7 }
  0x18   : > { %s1775_s28 = smov [#allocation3]  }
  0x19   : > { %s276_s17 = scalar_lea.vmem %s2232_s0, %s1466_s14  ;;  %s1773_s14 = smov 36  }
  0x1a   : > { %v1869_v0 = vld [vmem:[%s276_s17] sm:$0xff]  ;;  %v278_v1 = vld [vmem:[%s276_s17 + $0x8] sm:$0xf] }
  0x1b   : > { %297 = vrot.lane.b32.xlu0 %v1869_v0, %s1760_s18  ;;  %v284_v2 = vcombine.low %v278_v1, %v278_v1  ;;  %v281_v3 = vcombine.high %v1869_v0, %v1869_v0  ;;  %v283_v5 = vcombine.low %v1869_v0, %v1869_v0 }
  0x1d   : > { %v1531_v4 = vpack.i.bf16 %v284_v2, %v1869_v0  ;;  %v1526_v6 = vpack.i.bf16 %v278_v1, %v281_v3 }
  0x1f   : > { %1532 = vrot.lane.b32.xlu1 %v1531_v4, %s1761_s19  ;;  %1522 = vrot.lane.b32.xlu0 %v1531_v4, %s1762_s20 }
  0x23   : > { %285 = vrot.lane.b32.xlu1 %v283_v5, %s1762_s20  ;;  %1527 = vrot.lane.b32.xlu0 %v1526_v6, %s1760_s18 }
  0x27   : > { %309 = vrot.lane.b32.xlu1 %v283_v5, %s1761_s19  ;;  %1537 = vrot.lane.b32.xlu0 %v1526_v6, %s1763_s21 }
  0x2b   : > { %1542 = vrot.lane.b32.xlu1 %v1531_v4, %s1764_s22  ;;  %1547 = vrot.lane.b32.xlu0 %v1526_v6, %s1765_s23 }
  0x2f   : > { %1552 = vrot.lane.b32.xlu1 %v1531_v4, %s1766_s29  ;;  %321 = vrot.lane.b32.xlu0 %v1869_v0, %s1763_s21 }
  0x33   : > { %333 = vrot.lane.b32.xlu1 %v283_v5, %s1764_s22  ;;  %345 = vrot.lane.b32.xlu0 %v1869_v0, %s1765_s23 }
  0x37   : > { %357 = vrot.lane.b32.xlu1 %v283_v5, %s1766_s29  ;;  %371 = vrot.lane.b32.xlu0 %v281_v3, %s1767_s8 }
  0x3b   : > { %373 = vrot.lane.b32.xlu1 %v278_v1, %s1767_s8  ;;  %369 = vrot.lane.b32.xlu0 %v1869_v0, %s1767_s8 }
  0x8d   : > { %v298_v7 = vpop.permute.xlu0 %297 }
  0x91   : > { %v1533_v8 = vpop.permute.xlu1 %1532  ;;  %v1523_v9 = vpop.permute.xlu0 %1522 }
  0x92   : > { %v1525_v10 = vunpack.i.h.bf16 %v1523_v9  ;;  %v1524_v11 = vunpack.i.l.bf16 %v1523_v9  ;;  %v1535_v12 = vunpack.i.h.bf16 %v1533_v8  ;;  %v1534_v13 = vunpack.i.l.bf16 %v1533_v8  ;;  %v392_v9 = vld [vmem:[%s2234_s2] sm:$0xff] }
  0x94   : > { %v293_v14 = vsel %vm291_vm0, %v1524_v11, %v1525_v10  ;;  %v381_v15 = vsel %vm378_vm1, %v278_v1, %v1525_v10  ;;  %v317_v22 = vsel %vm315_vm2, %v1534_v13, %v1535_v12  ;;  %v1769_v1 = vmov 0.0  }
  0x95   : > { %v286_v16 = vpop.permute.xlu1 %285  ;;  %v1528_v17 = vpop.permute.xlu0 %1527  ;;  %v380_v18 = vsel %vm378_vm1, %v281_v3, %v293_v14  ;;  %537 = vmatprep.mubr.f32.mxu1 %v1769_v1  ;;  %903 = vmatprep.mubr.f32.mxu0 %v1769_v1  ;;  %637 = vst.msk [vmem:[#allocation2] sm:$0xff] %vm463_vm8, %v1769_v1  ;;  %v1770_v10 = vmov 0  }
  0x96   : > { %v1530_v19 = vunpack.i.h.bf16 %v1528_v17  ;;  %v1529_v20 = vunpack.i.l.bf16 %v1528_v17  ;;  %v1556_v21 = vpack.i.bf16 %v381_v15, %v380_v18  ;;  %v292_v23 = vsel %vm291_vm0, %v286_v16, %v1524_v11  ;;  %1586 = vset.pattern.permute.xlu0 %v1770_v10  ;;  %1682 = vset.pattern.permute.xlu1 %v1770_v10  ;;  %639 = vst.msk [vmem:[#allocation2 + $0x10] sm:$0xff] %vm638_vm12, %v1769_v1 }
  0x97   : > { %v379_v34 = vsel %vm378_vm1, %v1869_v0, %v292_v23 }
  0x98   : > { %v305_v24 = vsel %vm303_vm3, %v1529_v20, %v1530_v19  ;;  %1557 = vrot.lane.b32.xlu1 %v1556_v21, %s1768_s9  ;;  %v384_v25 = vsel %vm378_vm1, %v1530_v19, %v1535_v12  ;;  %v304_v27 = vsel %vm303_vm3, %v298_v7, %v1529_v20 }
  0x99   : > { %v310_v26 = vpop.permute.xlu1 %309  ;;  %v1538_v28 = vpop.permute.xlu0 %1537  ;;  %v383_v29 = vsel %vm378_vm1, %v305_v24, %v317_v22 }
  0x9a   : > { %v316_v30 = vsel %vm315_vm2, %v310_v26, %v1534_v13  ;;  %v1540_v31 = vunpack.i.h.bf16 %v1538_v28  ;;  %v1539_v32 = vunpack.i.l.bf16 %v1538_v28  ;;  %v1561_v33 = vpack.i.bf16 %v384_v25, %v383_v29 }
  0x9b   : > { %v382_v35 = vsel %vm378_vm1, %v304_v27, %v316_v30 }
  0x9c   : > { %1562 = vrot.lane.b32.xlu0 %v1561_v33, %s1768_s9  ;;  %v1566_v36 = vpack.i.bf16 %v382_v35, %v379_v34  ;;  %v329_v39 = vsel %vm327_vm4, %v1539_v32, %v1540_v31 }
  0x9d   : > { %v1543_v37 = vpop.permute.xlu1 %1542  ;;  %v1548_v38 = vpop.permute.xlu0 %1547 }
  0x9e   : > { %v1545_v40 = vunpack.i.h.bf16 %v1543_v37  ;;  %v1544_v41 = vunpack.i.l.bf16 %v1543_v37  ;;  %v1550_v42 = vunpack.i.h.bf16 %v1548_v38  ;;  %v1549_v43 = vunpack.i.l.bf16 %v1548_v38  ;;  %1567 = vrot.lane.b32.xlu1 %v1566_v36, %s1768_s9 }
  0xa0   : > { %v341_v44 = vsel %vm339_vm5, %v1544_v41, %v1545_v40  ;;  %v387_v45 = vsel %vm378_vm1, %v1540_v31, %v1545_v40  ;;  %v353_v52 = vsel %vm351_vm6, %v1549_v43, %v1550_v42 }
  0xa1   : > { %v1553_v46 = vpop.permute.xlu1 %1552  ;;  %v322_v47 = vpop.permute.xlu0 %321  ;;  %v386_v48 = vsel %vm378_vm1, %v329_v39, %v341_v44 }
  0xa2   : > { %v1555_v49 = vunpack.i.h.bf16 %v1553_v46  ;;  %v1554_v50 = vunpack.i.l.bf16 %v1553_v46  ;;  %v1571_v51 = vpack.i.bf16 %v387_v45, %v386_v48  ;;  %v328_v62 = vsel %vm327_vm4, %v322_v47, %v1539_v32  ;;  %v391_v45 = vld [vmem:[%s2233_s1] sm:$0xff] }
  0xa3   : > { %v1771_v48 = vmov 0.0|0.0  }
  0xa4   : > { %v365_v53 = vsel %vm363_vm7, %v1554_v50, %v1555_v49  ;;  %1572 = vrot.lane.b32.xlu0 %v1571_v51, %s1768_s9  ;;  %v390_v54 = vsel %vm378_vm1, %v1550_v42, %v1555_v49 }
  0xa5   : > { %v334_v55 = vpop.permute.xlu1 %333  ;;  %v346_v56 = vpop.permute.xlu0 %345  ;;  %v389_v57 = vsel %vm378_vm1, %v353_v52, %v365_v53 }
  0xa6   : > { %v1576_v58 = vpack.i.bf16 %v390_v54, %v389_v57  ;;  %v340_v59 = vsel %vm339_vm5, %v334_v55, %v1544_v41  ;;  %v352_v63 = vsel %vm351_vm6, %v346_v56, %v1549_v43  ;;  %v617_v54 = vld [vmem:[%s2237_s5] sm:$0x7] }
  0xa7   : > { %v385_v2 = vsel %vm378_vm1, %v328_v62, %v340_v59 }
  0xa8   : > { %1577 = vrot.lane.b32.xlu1 %v1576_v58, %s1768_s9 }
  0xa9   : > { %v358_v60 = vpop.permute.xlu1 %357  ;;  %v372_v61 = vpop.permute.xlu0 %371 }
  0xaa   : > { %v364_v0 = vsel %vm363_vm7, %v358_v60, %v1554_v50  ;;  %v619_v50 = vlaneseq }
  0xab   : > { %v388_v3 = vsel %vm378_vm1, %v352_v63, %v364_v0 }
  0xac   : > { %v1581_v4 = vpack.i.bf16 %v388_v3, %v385_v2  ;;  %v620_v51 = vshrl.u32 %v619_v50, 7 }
  0xad   : > { %v374_v5 = vpop.permute.xlu1 %373  ;;  %v370_v6 = vpop.permute.xlu0 %369 }
  0xae   : > { %1582 = vrot.lane.b32.xlu0 %v1581_v4, %s1768_s9  ;;  %v377_v7 = vsel %vm375_vm9, %v372_v61, %v374_v5  ;;  %v376_v8 = vsel %vm375_vm9, %v370_v6, %v372_v61  ;;  %v621_v52 = vsub.s32 0, %v620_v51  ;;  %v625_v59 = vsub.s32 1, %v620_v51 }
  0xaf   : > { %436 = vrot.lane.b32.xlu1 %v377_v7, %s1768_s9  ;;  %v629_v2 = vsub.s32 2, %v620_v51 }
  0xb0   : > { %v622_v57 = vrot.slane %v617_v54, %v621_v52  ;;  %v626_v0 = vrot.slane %v617_v54, %v625_v59 }
  0xb1   : > { %v630_v6 = vrot.slane %v617_v54, %v629_v2 }
  0xb2   : > { %438 = vrot.lane.b32.xlu0 %v374_v5, %s1768_s9 }
  0xb3   : > { %434 = vrot.lane.b32.xlu1 %v376_v8, %s1768_s9 }
  0xb6   : > { %395 = vperm.xlu0 %1586, %v392_v9  }
 0x10a   : > { %v1558_v11 = vpop.permute.xlu1 %1557 }
 0x10b   : > { %v1560_v12 = vunpack.i.h.bf16 %v1558_v11  ;;  %v1559_v13 = vunpack.i.l.bf16 %v1558_v11 }
 0x10d   : > { %v442_v17 = vsel %vm440_vm10, %v1559_v13, %v1560_v12 }
 0x10e   : > { %v1563_v14 = vpop.permute.xlu0 %1562 }
 0x10f   : > { %v1565_v15 = vunpack.i.h.bf16 %v1563_v14  ;;  %v1564_v16 = vunpack.i.l.bf16 %v1563_v14 }
 0x110   : > { %v1568_v18 = vpop.permute.xlu1 %1567 }
 0x111   : > { %v1570_v19 = vunpack.i.h.bf16 %v1568_v18  ;;  %v1569_v20 = vunpack.i.l.bf16 %v1568_v18  ;;  %v444_v21 = vsel %vm440_vm10, %v1564_v16, %v1565_v15  ;;  %v1397_v47 = vpack.c.bf16 %v1565_v15, %v1560_v12 }
 0x112   : > { %v1388_v22 = vpack.c.bf16 %v444_v21, %v442_v17 }
 0x113   : > { %v441_v23 = vsel %vm440_vm10, %v1569_v20, %v1559_v13  ;;  %v443_v24 = vsel %vm440_vm10, %v1570_v19, %v1564_v16 }
 0x114   : > { %1389 = vmatprep.subr.bf16.mxu1 %v1388_v22  ;;  %v1390_v25 = vpack.c.bf16 %v443_v24, %v441_v23 }
 0x116   : > { %v1573_v26 = vpop.permute.xlu0 %1572  ;;  %1391 = vmatpush1.bf16.msra.mxu1 %v1390_v25 }
 0x117   : > { %v1575_v27 = vunpack.i.h.bf16 %v1573_v26  ;;  %v1574_v28 = vunpack.i.l.bf16 %v1573_v26 }
 0x119   : > { %v446_v32 = vsel %vm440_vm10, %v1574_v28, %v1575_v27 }
 0x11a   : > { %v1578_v29 = vpop.permute.xlu1 %1577 }
 0x11b   : > { %v1580_v30 = vunpack.i.h.bf16 %v1578_v29  ;;  %v1579_v31 = vunpack.i.l.bf16 %v1578_v29 }
 0x11d   : > { %v448_v33 = vsel %vm440_vm10, %v1579_v31, %v1580_v30  ;;  %v1400_v49 = vpack.c.bf16 %v1580_v30, %v1575_v27 }
 0x11e   : > { %v1392_v34 = vpack.c.bf16 %v448_v33, %v446_v32 }
 0x120   : > { %v1583_v35 = vpop.permute.xlu0 %1582  ;;  %1393 = vmatprep.subr.bf16.mxu1 %v1392_v34 }
 0x121   : > { %v1585_v36 = vunpack.i.h.bf16 %v1583_v35  ;;  %v1584_v37 = vunpack.i.l.bf16 %v1583_v35  ;;  %v437_v38 = vpop.permute.xlu1 %436 }
 0x123   : > { %v445_v39 = vsel %vm440_vm10, %v1584_v37, %v1574_v28  ;;  %v447_v40 = vsel %vm440_vm10, %v1585_v36, %v1579_v31 }
 0x124   : > { %v439_v41 = vpop.permute.xlu0 %438  ;;  %v1394_v42 = vpack.c.bf16 %v447_v40, %v445_v39 }
 0x125   : > { %v450_v43 = vsel %vm440_vm10, %v437_v38, %v439_v41  ;;  %v435_v44 = vpop.permute.xlu1 %434 }
 0x126   : > { %1395 = vmatpush1.bf16.msra.mxu1 %v1394_v42  ;;  %v449_v46 = vsel %vm440_vm10, %v435_v44, %v437_v38 }
 0x127   : > { %1280 = vmatprep.subr.msk.mxu1 %vm378_vm1, %v450_v43 }
 0x12a   : > { %1281 = vmatpush1.msk.msra.mxu1 %vm378_vm1, %v449_v46 }
 0x12b   : > { %1282 = vmatmul.mubr.msk.f32.vlgmr.msra.gmra.mrb[0].mxu1 %vm463_vm8, %v391_v45  ;;  %1396 = vmatprep.subr.bf16.mxu1 %v1771_v48 }
 0x12c   : > { %1398 = vmatpush3.bf16.msra.mxu1 %v1397_v47  ;;  %1357 = vmatprep.mubr.msk.f32.mxu1 %vm1772_vm11, %v1769_v1 }
 0x12d   : > { %1399 = vmatprep.subr.bf16.mxu1 %v1771_v48 }
 0x130   : > { %1401 = vmatpush3.bf16.msra.mxu1 %v1400_v49 }
 0x131   : > { %1355 = vmatprep.subr.mxu1 %v1769_v1 }
 0x134   : > { %1356 = vmatpush3.msk.msra.mxu1 %vm378_vm1, %v439_v41  ;;  %vm1055_vm1 = vcmask 1044480  }
 0x135   : > { %1358 = vmatmul.mubr.msk.f32.vlgmr.msra.gmra.mrb[2].mxu1 %vm463_vm8, %v391_v45  ;;  %1418 = vmatprep.subr.bf16.mxu1 %v1771_v48  ;;  %v396_v53 = vpop.permute.xlu0 %395 }
 0x136   : > { %1378 = vmatprep.mubr.msk.f32.mxu1 %vm1772_vm11, %v1769_v1 }
 0x1fe   : > { %v539_v55 = vpop.f32.mrb[0].mxu1 }
 0x1ff   : > { %v540_v56 = vadd.f32 %v539_v55, %v396_v53  ;;  %v541_v58 = vpop.f32.mrb[1].mxu1 }
 0x200   : > { %v542_v60 = vadd.f32 %v541_v58, %v396_v53 }
 0x201   : > { %v614_v61 = vmax.f32 %v540_v56, 0.0 }
 0x202   : > { %v615_v63 = vmax.f32 %v542_v60, 0.0 }
 0x203   : > { %v634_v62 = vmul.f32 %v622_v57, %v614_v61 }
 0x204   : > { %v635_v3 = vmul.f32 %v626_v0, %v615_v63 }
 0x205   : > { %643 = vrot.lane.b32.xlu1 %v634_v62, %s1773_s14 }
 0x208   : > { %v610_v4 = vpop.f32.mrb[2].mxu1 }
 0x209   : > { %v611_v5 = vadd.f32 %v610_v4, %v396_v53  ;;  %v1359_v7 = vpop.f32.mrb[3].mxu1  ;;  %645 = vrot.lane.b32.xlu1 %v635_v3, %s1773_s14 }
 0x20b   : > { %v616_v8 = vmax.f32 %v611_v5, 0.0 }
 0x20d   : > { %v636_v9 = vmul.f32 %v630_v6, %v616_v8 }
 0x20f   : > { %647 = vrot.lane.b32.xlu0 %v636_v9, %s1773_s14 }
 0x277   : > { %v644_v10 = vpop.permute.xlu1 %643 }
 0x278   : > { %655 = vst.msk [vmem:[#allocation2] sm:$0xff] %vm654_vm13, %v644_v10 }
 0x27b   : > { %v646_v11 = vpop.permute.xlu1 %645 }
 0x27c   : > { %v649_v12 = vsel %vm463_vm8, %v644_v10, %v646_v11 }
 0x27f   : > { %v659_v13 = vld [vmem:[#allocation2] sm:$0xff] }
 0x280   : > { %673 = vrot.lane.b32.xlu1 %v659_v13, %s1760_s18  ;;  %665 = vrot.lane.b32.xlu0 %v659_v13, %s1762_s20 }
 0x281   : > { %v648_v14 = vpop.permute.xlu0 %647 }
 0x282   : > { %v650_v15 = vsel %vm463_vm8, %v646_v11, %v648_v14  ;;  %v730_v14 = vld [vmem:[%s2236_s4] sm:$0xff] }
 0x283   : > { %658 = vst.msk [vmem:[#allocation2 + $0x10] sm:$0xff] %vm657_vm14, %v650_v15 }
 0x284   : > { %689 = vrot.lane.b32.xlu1 %v659_v13, %s1763_s21  ;;  %681 = vrot.lane.b32.xlu0 %v659_v13, %s1761_s19 }
 0x288   : > { %705 = vrot.lane.b32.xlu1 %v659_v13, %s1765_s23  ;;  %697 = vrot.lane.b32.xlu0 %v659_v13, %s1764_s22 }
 0x28a   : > { %v661_v16 = vld [vmem:[#allocation2 + $0x10] sm:$0xff] }
 0x28b   : > { %v1597_v17 = vpack.i.bf16 %v661_v16, %v649_v12 }
 0x28d   : > { %1598 = vrot.lane.b32.xlu0 %v1597_v17, %s1761_s19  ;;  %1588 = vrot.lane.b32.xlu1 %v1597_v17, %s1762_s20 }
 0x291   : > { %1608 = vrot.lane.b32.xlu0 %v1597_v17, %s1764_s22  ;;  %1593 = vrot.lane.b32.xlu1 %v1597_v17, %s1760_s18 }
 0x295   : > { %1618 = vrot.lane.b32.xlu0 %v1597_v17, %s1766_s29  ;;  %1603 = vrot.lane.b32.xlu1 %v1597_v17, %s1763_s21 }
 0x299   : > { %713 = vrot.lane.b32.xlu0 %v659_v13, %s1766_s29  ;;  %1613 = vrot.lane.b32.xlu1 %v1597_v17, %s1765_s23 }
 0x29d   : > { %725 = vrot.lane.b32.xlu0 %v661_v16, %s1767_s8  ;;  %723 = vrot.lane.b32.xlu1 %v649_v12, %s1767_s8 }
 0x2a1   : > { %1623 = vrot.lane.b32.xlu0 %v1597_v17, %s1768_s9  ;;  %721 = vrot.lane.b32.xlu1 %v659_v13, %s1767_s8  ;;  %s1700_s8 = sshll.u32 %s1775_s28, 4  ;;  %s1701_s8 = int_to_ptr.vmem [resolvable:$false] %s1700_s8 }
 0x2f2   : > { %v666_v18 = vpop.permute.xlu0 %665  ;;  %v674_v19 = vpop.permute.xlu1 %673 }
 0x2f6   : > { %v682_v20 = vpop.permute.xlu0 %681  ;;  %v690_v21 = vpop.permute.xlu1 %689 }
 0x2fa   : > { %v698_v22 = vpop.permute.xlu0 %697  ;;  %v706_v23 = vpop.permute.xlu1 %705 }
 0x2ff   : > { %v1599_v24 = vpop.permute.xlu0 %1598  ;;  %v1589_v25 = vpop.permute.xlu1 %1588 }
 0x300   : > { %v1590_v26 = vunpack.i.l.bf16 %v1589_v25  ;;  %v1600_v27 = vunpack.i.l.bf16 %v1599_v24  ;;  %v1591_v32 = vunpack.i.h.bf16 %v1589_v25  ;;  %v1601_v39 = vunpack.i.h.bf16 %v1599_v24 }
 0x302   : > { %v671_v28 = vsel %vm291_vm0, %v666_v18, %v1590_v26  ;;  %v687_v36 = vsel %vm315_vm2, %v682_v20, %v1600_v27  ;;  %v672_v40 = vsel %vm291_vm0, %v1590_v26, %v1591_v32  ;;  %v688_v49 = vsel %vm315_vm2, %v1600_v27, %v1601_v39 }
 0x303   : > { %v1609_v29 = vpop.permute.xlu0 %1608  ;;  %v1594_v30 = vpop.permute.xlu1 %1593  ;;  %v1627_v31 = vpack.i.bf16 %v671_v28, %v659_v13  ;;  %v1642_v45 = vpack.i.bf16 %v1591_v32, %v672_v40  ;;  %v1652_v54 = vpack.i.bf16 %v1601_v39, %v688_v49 }
 0x304   : > { %v1595_v33 = vunpack.i.l.bf16 %v1594_v30  ;;  %v1610_v34 = vunpack.i.l.bf16 %v1609_v29  ;;  %v1596_v41 = vunpack.i.h.bf16 %v1594_v30  ;;  %v1611_v46 = vunpack.i.h.bf16 %v1609_v29 }
 0x305   : > { %1628 = vrot.lane.b32.xlu0 %v1627_v31, %s1768_s9 }
 0x306   : > { %v679_v35 = vsel %vm303_vm3, %v674_v19, %v1595_v33  ;;  %v703_v44 = vsel %vm339_vm5, %v698_v22, %v1610_v34  ;;  %v680_v50 = vsel %vm303_vm3, %v1595_v33, %v1596_v41  ;;  %v704_v55 = vsel %vm339_vm5, %v1610_v34, %v1611_v46 }
 0x307   : > { %v1604_v37 = vpop.permute.xlu1 %1603  ;;  %v1632_v38 = vpack.i.bf16 %v687_v36, %v679_v35  ;;  %v1619_v51 = vpop.permute.xlu0 %1618  ;;  %v1647_v56 = vpack.i.bf16 %v1596_v41, %v680_v50  ;;  %v1662_v62 = vpack.i.bf16 %v1611_v46, %v704_v55  ;;  %vm1774_vm3 = vmmov 1  }
 0x308   : > { %v1605_v42 = vunpack.i.l.bf16 %v1604_v37  ;;  %v1606_v52 = vunpack.i.h.bf16 %v1604_v37  ;;  %v1621_v57 = vunpack.i.h.bf16 %v1619_v51  ;;  %v1620_v58 = vunpack.i.l.bf16 %v1619_v51 }
 0x309   : > { %1633 = vrot.lane.b32.xlu1 %v1632_v38, %s1768_s9  ;;  %vm1051_vm5 = vcmask 105472  }
 0x30a   : > { %v695_v43 = vsel %vm327_vm4, %v690_v21, %v1605_v42  ;;  %v696_v59 = vsel %vm327_vm4, %v1605_v42, %v1606_v52  ;;  %v720_v2 = vsel %vm363_vm7, %v1620_v58, %v1621_v57  ;;  %vm1464_vm4 = vmpackc.low %vm1055_vm1, %vm1774_vm3 }
 0x30b   : > { %v1637_v47 = vpack.i.bf16 %v703_v44, %v695_v43  ;;  %v1614_v53 = vpop.permute.xlu1 %1613  ;;  %v1657_v63 = vpack.i.bf16 %v1606_v52, %v696_v59  ;;  %v714_v0 = vpop.permute.xlu0 %713  ;;  %v1677_v4 = vpack.i.bf16 %v1621_v57, %v720_v2 }
 0x30c   : > { %v1616_v60 = vunpack.i.h.bf16 %v1614_v53  ;;  %v1615_v61 = vunpack.i.l.bf16 %v1614_v53  ;;  %v719_v9 = vsel %vm363_vm7, %v714_v0, %v1620_v58 }
 0x30d   : > { %1643 = vrot.lane.b32.xlu1 %v1642_v45, %s1768_s9  ;;  %1638 = vrot.lane.b32.xlu0 %v1637_v47, %s1768_s9 }
 0x30e   : > { %v712_v3 = vsel %vm351_vm6, %v1615_v61, %v1616_v60  ;;  %v711_v7 = vsel %vm351_vm6, %v706_v23, %v1615_v61 }
 0x30f   : > { %v1667_v5 = vpack.i.bf16 %v1616_v60, %v712_v3  ;;  %v724_v6 = vpop.permute.xlu1 %723  ;;  %v726_v8 = vpop.permute.xlu0 %725  ;;  %v1672_v10 = vpack.i.bf16 %v719_v9, %v711_v7 }
 0x310   : > { %v728_v11 = vsel %vm375_vm9, %v724_v6, %v726_v8 }
 0x311   : > { %1648 = vrot.lane.b32.xlu1 %v1647_v56, %s1768_s9  ;;  %1653 = vrot.lane.b32.xlu0 %v1652_v54, %s1768_s9 }
 0x313   : > { %v722_v12 = vpop.permute.xlu1 %721  ;;  %v1624_v15 = vpop.permute.xlu0 %1623 }
 0x314   : > { %v727_v13 = vsel %vm375_vm9, %v722_v12, %v724_v6  ;;  %v1626_v18 = vunpack.i.h.bf16 %v1624_v15  ;;  %v1625_v19 = vunpack.i.l.bf16 %v1624_v15 }
 0x315   : > { %1663 = vrot.lane.b32.xlu1 %v1662_v62, %s1768_s9  ;;  %1658 = vrot.lane.b32.xlu0 %v1657_v63, %s1768_s9 }
 0x316   : > { %v791_v26 = vsel %vm440_vm10, %v1625_v19, %v1626_v18 }
 0x319   : > { %1668 = vrot.lane.b32.xlu1 %v1667_v5, %s1768_s9  ;;  %1678 = vrot.lane.b32.xlu0 %v1677_v4, %s1768_s9 }
 0x31d   : > { %1673 = vrot.lane.b32.xlu1 %v1672_v10, %s1768_s9  ;;  %786 = vrot.lane.b32.xlu0 %v728_v11, %s1768_s9 }
 0x321   : > { %788 = vrot.lane.b32.xlu1 %v726_v8, %s1768_s9  ;;  %784 = vrot.lane.b32.xlu0 %v727_v13, %s1768_s9  ;;  %s1702_s9 = scalar_lea.vmem %s1701_s8, 256 }
 0x325   : > { %733 = vperm.xlu1 %1682, %v730_v14  }
 0x377   : > { %v1629_v16 = vpop.permute.xlu0 %1628 }
 0x378   : > { %v1630_v20 = vunpack.i.l.bf16 %v1629_v16  ;;  %v1631_v23 = vunpack.i.h.bf16 %v1629_v16 }
 0x37a   : > { %v790_v29 = vsel %vm440_vm10, %v1630_v20, %v1625_v19 }
 0x37b   : > { %v1634_v17 = vpop.permute.xlu1 %1633 }
 0x37c   : > { %v1635_v31 = vunpack.i.l.bf16 %v1634_v17  ;;  %v1636_v40 = vunpack.i.h.bf16 %v1634_v17  ;;  %v729_v17 = vld [vmem:[%s2235_s3] sm:$0xff] }
 0x37f   : > { %v1644_v21 = vpop.permute.xlu1 %1643  ;;  %v1639_v22 = vpop.permute.xlu0 %1638 }
 0x380   : > { %v1646_v24 = vunpack.i.h.bf16 %v1644_v21  ;;  %v1645_v25 = vunpack.i.l.bf16 %v1644_v21  ;;  %v1640_v45 = vunpack.i.l.bf16 %v1639_v22  ;;  %v1641_v55 = vunpack.i.h.bf16 %v1639_v22 }
 0x382   : > { %v1419_v27 = vpack.c.bf16 %v1646_v24, %v1626_v18  ;;  %v793_v28 = vsel %vm440_vm10, %v1645_v25, %v1646_v24  ;;  %v792_v30 = vsel %vm440_vm10, %v1631_v23, %v1645_v25 }
 0x383   : > { %v1649_v32 = vpop.permute.xlu1 %1648  ;;  %v1654_v33 = vpop.permute.xlu0 %1653  ;;  %v1402_v34 = vpack.c.bf16 %v793_v28, %v791_v26  ;;  %v1404_v35 = vpack.c.bf16 %v792_v30, %v790_v29  ;;  %v1033_v30 = vld [vmem:[%s2238_s6 + $0x80] sm:$0xff] }
 0x384   : > { %v1651_v36 = vunpack.i.h.bf16 %v1649_v32  ;;  %v1650_v37 = vunpack.i.l.bf16 %v1649_v32  ;;  %v1656_v38 = vunpack.i.h.bf16 %v1654_v33  ;;  %v1655_v39 = vunpack.i.l.bf16 %v1654_v33  ;;  %1420 = vmatpush3.bf16.msra.mxu1 %v1419_v27  ;;  %v1017_v32 = vld [vmem:[%s2238_s6] sm:$0xff] }
 0x385   : > { %1403 = vmatprep.subr.bf16.mxu0 %v1402_v34  ;;  %1421 = vmatprep.subr.bf16.mxu1 %v1771_v48 }
 0x386   : > { %v1422_v41 = vpack.c.bf16 %v1656_v38, %v1651_v36  ;;  %1405 = vmatpush1.bf16.msra.mxu0 %v1404_v35  ;;  %v795_v42 = vsel %vm440_vm10, %v1650_v37, %v1651_v36  ;;  %v797_v43 = vsel %vm440_vm10, %v1655_v39, %v1656_v38  ;;  %v794_v44 = vsel %vm440_vm10, %v1635_v31, %v1650_v37  ;;  %v1034_v31 = vld [vmem:[%s2238_s6 + $0x88] sm:$0xff]  ;;  %v1035_v36 = vld [vmem:[%s2238_s6 + $0x90] sm:$0xff]  ;;  %v1036_v37 = vld [vmem:[%s2238_s6 + $0x98] sm:$0xff] }
 0x387   : > { %v1664_v46 = vpop.permute.xlu1 %1663  ;;  %v1659_v47 = vpop.permute.xlu0 %1658  ;;  %v1406_v49 = vpack.c.bf16 %v797_v43, %v795_v42  ;;  %v796_v50 = vsel %vm440_vm10, %v1636_v40, %v1655_v39  ;;  %v1430_v34 = vpack.c.bf16 %v1034_v31, %v1033_v30  ;;  %v1018_v35 = vld [vmem:[%s2238_s6 + $0x8] sm:$0xff]  ;;  %v1434_v40 = vpack.c.bf16 %v1036_v37, %v1035_v36  ;;  %v1020_v42 = vld [vmem:[%s2238_s6 + $0x18] sm:$0xff]  ;;  %v1037_v43 = vld [vmem:[%s2238_s6 + $0xa0] sm:$0xff] }
 0x388   : > { %v1666_v51 = vunpack.i.h.bf16 %v1664_v46  ;;  %v1665_v52 = vunpack.i.l.bf16 %v1664_v46  ;;  %v1661_v53 = vunpack.i.h.bf16 %v1659_v47  ;;  %v1660_v54 = vunpack.i.l.bf16 %v1659_v47  ;;  %1423 = vmatpush3.bf16.msra.mxu1 %v1422_v41  ;;  %v1019_v41 = vld [vmem:[%s2238_s6 + $0x10] sm:$0xff]  ;;  %v1049_v47 = vld [vmem:[%s2238_s6 + $0x100] sm:$0xff] }
 0x389   : > { %1407 = vmatprep.subr.bf16.mxu0 %v1406_v49  ;;  %v1408_v56 = vpack.c.bf16 %v796_v50, %v794_v44  ;;  %1424 = vmatprep.subr.bf16.mxu1 %v1771_v48  ;;  %v1432_v39 = vpack.c.bf16 %v1018_v35, %v1017_v32  ;;  %v1038_v44 = vld [vmem:[%s2238_s6 + $0xa8] sm:$0xff]  ;;  %v1436_v46 = vpack.c.bf16 %v1020_v42, %v1019_v41 }
 0x38a   : > { %v1425_v57 = vpack.c.bf16 %v1666_v51, %v1661_v53  ;;  %v799_v58 = vsel %vm440_vm10, %v1660_v54, %v1661_v53  ;;  %v801_v59 = vsel %vm440_vm10, %v1665_v52, %v1666_v51  ;;  %v798_v60 = vsel %vm440_vm10, %v1640_v45, %v1660_v54  ;;  %v1050_v49 = vld [vmem:[%s2238_s6 + $0x108] sm:$0x1f]  ;;  %v1021_v51 = vld [vmem:[%s2238_s6 + $0x20] sm:$0xff] }
 0x38b   : > { %1409 = vmatpush1.bf16.msra.mxu0 %v1408_v56  ;;  %v1669_v61 = vpop.permute.xlu1 %1668  ;;  %v1679_v62 = vpop.permute.xlu0 %1678  ;;  %v1410_v63 = vpack.c.bf16 %v801_v59, %v799_v58  ;;  %v800_v0 = vsel %vm440_vm10, %v1641_v55, %v1665_v52  ;;  %v1438_v50 = vpack.c.bf16 %v1038_v44, %v1037_v43  ;;  %v1022_v52 = vld [vmem:[%s2238_s6 + $0x28] sm:$0xff]  ;;  %v1463_v53 = vpack.c.bf16 %v1050_v49, %v1049_v47  ;;  %v1039_v55 = vld [vmem:[%s2238_s6 + $0xb0] sm:$0xff]  ;;  %v1040_v56 = vld [vmem:[%s2238_s6 + $0xb8] sm:$0xff] }
 0x38c   : > { %v1671_v2 = vunpack.i.h.bf16 %v1669_v61  ;;  %v1670_v3 = vunpack.i.l.bf16 %v1669_v61  ;;  %v1681_v4 = vunpack.i.h.bf16 %v1679_v62  ;;  %v1680_v5 = vunpack.i.l.bf16 %v1679_v62  ;;  %1426 = vmatpush3.bf16.msra.mxu1 %v1425_v57  ;;  %v1023_v58 = vld [vmem:[%s2238_s6 + $0x30] sm:$0xff]  ;;  %v1024_v59 = vld [vmem:[%s2238_s6 + $0x38] sm:$0xff]  ;;  %v1041_v61 = vld [vmem:[%s2238_s6 + $0xc0] sm:$0xff] }
 0x38d   : > { %1411 = vmatprep.subr.bf16.mxu0 %v1410_v63  ;;  %v1412_v6 = vpack.c.bf16 %v800_v0, %v798_v60  ;;  %1427 = vmatprep.subr.bf16.mxu1 %v1771_v48  ;;  %v1440_v54 = vpack.c.bf16 %v1022_v52, %v1021_v51  ;;  %v1442_v57 = vpack.c.bf16 %v1040_v56, %v1039_v55  ;;  %v1042_v62 = vld [vmem:[%s2238_s6 + $0xc8] sm:$0xff]  ;;  %v1025_v63 = vld [vmem:[%s2238_s6 + $0x40] sm:$0xff] }
 0x38e   : > { %v1428_v7 = vpack.c.bf16 %v1681_v4, %v1671_v2  ;;  %v803_v8 = vsel %vm440_vm10, %v1670_v3, %v1671_v2  ;;  %v805_v9 = vsel %vm440_vm10, %v1680_v5, %v1681_v4  ;;  %v1444_v60 = vpack.c.bf16 %v1024_v59, %v1023_v58  ;;  %v1026_v2 = vld [vmem:[%s2238_s6 + $0x48] sm:$0xff]  ;;  %v1044_v4 = vld [vmem:[%s2238_s6 + $0xd8] sm:$0xff] }
 0x38f   : > { %1413 = vmatpush1.bf16.msra.mxu0 %v1412_v6  ;;  %v1674_v10 = vpop.permute.xlu1 %1673  ;;  %v787_v11 = vpop.permute.xlu0 %786  ;;  %v1414_v12 = vpack.c.bf16 %v805_v9, %v803_v8  ;;  %v1446_v0 = vpack.c.bf16 %v1042_v62, %v1041_v61  ;;  %v1028_v8 = vld [vmem:[%s2238_s6 + $0x58] sm:$0xff]  ;;  %v1045_v9 = vld [vmem:[%s2238_s6 + $0xe0] sm:$0xff] }
 0x390   : > { %v1676_v13 = vunpack.i.h.bf16 %v1674_v10  ;;  %v1675_v14 = vunpack.i.l.bf16 %v1674_v10  ;;  %1429 = vmatpush3.bf16.msra.mxu1 %v1428_v7  ;;  %v1027_v7 = vld [vmem:[%s2238_s6 + $0x50] sm:$0xff]  ;;  %v1046_v10 = vld [vmem:[%s2238_s6 + $0xe8] sm:$0xff] }
 0x391   : > { %1415 = vmatprep.subr.bf16.mxu0 %v1414_v12  ;;  %1376 = vmatprep.subr.mxu1 %v1769_v1  ;;  %v1454_v12 = vpack.c.bf16 %v1046_v10, %v1045_v9 }
 0x392   : > { %v802_v15 = vsel %vm440_vm10, %v1675_v14, %v1670_v3  ;;  %v804_v16 = vsel %vm440_vm10, %v1676_v13, %v1680_v5  ;;  %v1043_v3 = vld [vmem:[%s2238_s6 + $0xd0] sm:$0xff]  ;;  %v1448_v5 = vpack.c.bf16 %v1026_v2, %v1025_v63  ;;  %v1029_v13 = vld [vmem:[%s2238_s6 + $0x60] sm:$0xff]  ;;  %v1030_v14 = vld [vmem:[%s2238_s6 + $0x68] sm:$0xff] }
 0x393   : > { %v789_v18 = vpop.permute.xlu1 %788  ;;  %v1416_v19 = vpack.c.bf16 %v804_v16, %v802_v15  ;;  %v785_v21 = vpop.permute.xlu0 %784  ;;  %v1450_v6 = vpack.c.bf16 %v1044_v4, %v1043_v3  ;;  %v1456_v16 = vpack.c.bf16 %v1030_v14, %v1029_v13 }
 0x394   : > { %1377 = vmatpush3.msra.mxu1 %v789_v18  ;;  %v807_v20 = vsel %vm440_vm10, %v787_v11, %v789_v18  ;;  %v806_v22 = vsel %vm440_vm10, %v785_v21, %v787_v11  ;;  %v1452_v11 = vpack.c.bf16 %v1028_v8, %v1027_v7  ;;  %v1047_v18 = vld [vmem:[%s2238_s6 + $0xf0] sm:$0xff] }
 0x395   : > { %1417 = vmatpush1.bf16.msra.mxu0 %v1416_v19  ;;  %1379 = vmatmul.mubr.msk.f32.vlgmr.msra.gmra.mrb[4].mxu1 %vm835_vm15, %v729_v17  ;;  %v1048_v19 = vld [vmem:[%s2238_s6 + $0xf8] sm:$0xff]  ;;  %v1031_v21 = vld [vmem:[%s2238_s6 + $0x70] sm:$0xff] }
 0x396   : > { %855 = vmatprep.subr.mxu0 %v807_v20  ;;  %1462 = vmatprep.subr.bf16.mxu1 %v1771_v48  ;;  %v1458_v20 = vpack.c.bf16 %v1048_v19, %v1047_v18 }
 0x397   : > { %1385 = vmatprep.mubr.msk.f32.mxu1 %vm1772_vm11, %v1769_v1  ;;  %1465 = vmatpush3.bf16.msk.msra.mxu1 %vm1464_vm4, %v1463_v53 }
 0x399   : > { %856 = vmatpush1.msra.mxu0 %v806_v22  ;;  %v1032_v22 = vld [vmem:[%s2238_s6 + $0x78] sm:$0xff] }
 0x39a   : > { %1285 = vmatmul.mubr.msk.f32.vlgmr.msra.gmra.mrb[0].mxu0 %vm835_vm15, %v729_v17  ;;  %1431 = vmatprep.subr.bf16.mxu0 %v1430_v34 }
 0x39b   : > { %1433 = vmatpush3.bf16.msra.mxu0 %v1432_v39 }
 0x39c   : > { %1435 = vmatprep.subr.bf16.mxu0 %v1434_v40 }
 0x39f   : > { %1437 = vmatpush3.bf16.msra.mxu0 %v1436_v46 }
 0x3a0   : > { %1439 = vmatprep.subr.bf16.mxu0 %v1438_v50 }
 0x3a3   : > { %1441 = vmatpush3.bf16.msra.mxu0 %v1440_v54 }
 0x3a4   : > { %v734_v23 = vpop.permute.xlu1 %733  ;;  %1443 = vmatprep.subr.bf16.mxu0 %v1442_v57 }
 0x3a7   : > { %1445 = vmatpush3.bf16.msra.mxu0 %v1444_v60 }
 0x3a8   : > { %1447 = vmatprep.subr.bf16.mxu0 %v1446_v0 }
 0x3ab   : > { %1449 = vmatpush3.bf16.msra.mxu0 %v1448_v5 }
 0x3ac   : > { %1451 = vmatprep.subr.bf16.mxu0 %v1450_v6 }
 0x3af   : > { %1453 = vmatpush3.bf16.msra.mxu0 %v1452_v11 }
 0x3b0   : > { %1455 = vmatprep.subr.bf16.mxu0 %v1454_v12 }
 0x3b3   : > { %1457 = vmatpush3.bf16.msra.mxu0 %v1456_v16 }
 0x3b4   : > { %1459 = vmatprep.subr.bf16.mxu0 %v1458_v20 }
 0x468   : > { %v976_v24 = vpop.f32.mrb[4].mxu1 }
 0x469   : > { %v2053_v25 = vadd.f32 %v976_v24, %v734_v23  ;;  %v1380_v26 = vpop.f32.mrb[5].mxu1 }
 0x46b   : > { %v982_v27 = vmax.f32 %v2053_v25, 0.0 }
 0x46d   : > { %990 = vrot.lane.b32.xlu1 %v982_v27, %s1762_s20  ;;  %v905_v28 = vpop.f32.mrb[0].mxu0 }
 0x46e   : > { %v2059_v48 = vadd.f32 %v905_v28, %v734_v23  ;;  %v907_v29 = vpop.f32.mrb[1].mxu0 }
 0x46f   : > { %v2061_v1 = vadd.f32 %v907_v29, %v734_v23  ;;  %v1460_v23 = vpack.c.bf16 %v1032_v22, %v1031_v21 }
 0x470   : > { %v980_v33 = vmax.f32 %v2059_v48, 0.0 }
 0x471   : > { %v981_v38 = vmax.f32 %v2061_v1, 0.0  ;;  %1461 = vmatpush3.bf16.msra.mxu0 %v1460_v23 }
 0x473   : > { %v1683_v45 = vpack.i.bf16 %v980_v33, %v981_v38 }
 0x475   : > { %1684 = vrot.lane.b32.xlu0 %v1683_v45, %s1762_s20  ;;  %s2190_s20 = scalar_lea.hbm %s2239_s7, %s1290_s13 }
 0x4df   : > { %v991_v15 = vpop.permute.xlu1 %990 }
 0x4e0   : > { %v999_v17 = vmax.f32 %v982_v27, %v991_v15 }
 0x4e2   : > { %1007 = vrot.lane.b32.xlu1 %v999_v17, %s1761_s19 }
 0x4e7   : > { %v1685_v24 = vpop.permute.xlu0 %1684 }
 0x4e8   : > { %v1687_v25 = vunpack.i.h.bf16 %v1685_v24  ;;  %v1686_v26 = vunpack.i.l.bf16 %v1685_v24 }
 0x4ea   : > { %v992_v27 = vsel %vm291_vm0, %v1687_v25, %v1686_v26  ;;  %v993_v28 = vsel %vm291_vm0, %v1686_v26, %v991_v15  ;;  %vm1199_vm0 = vcmask 523264  }
 0x4eb   : > { %v997_v29 = vmax.f32 %v980_v33, %v992_v27  ;;  %v998_v30 = vmax.f32 %v981_v38, %v993_v28 }
 0x4ed   : > { %v1688_v31 = vpack.i.bf16 %v997_v29, %v998_v30 }
 0x4ef   : > { %1689 = vrot.lane.b32.xlu0 %v1688_v31, %s1761_s19  ;;  %s269_s19 = sand.u32 1, %s1750_s25  }
 0x4f0   : > { %s1278_s17 = sshll.u32 %s269_s19, 3  ;;  %s1202_s23 = scalar_lea.sflag [#allocation4], %s269_s19 }
 0x4f1   : > { %s271_s14 = scalar_lea.vmem [#allocation3], %s1278_s17 }
 0x4f2   : > { %s1215_s18 = sshll.u32 %s271_s14, 4  ;;  %s2192_s18 = int_to_ptr.vmem [resolvable:$true] %s1215_s18 }
 0x4f3   : > { %s1696_s29 = scalar_lea.vmem %s2192_s18, 128  ;;  %p1703_p0 = scmp.lt.s32.totalorder %s2192_s18, %s1701_s8 }
 0x4f4   : > { %p1697_p11 = scmp.ne.s32.totalorder %s2192_s18, %s1696_s29  ;;  %p1704_p1 = scmp.lt.s32.totalorder %s1702_s9, %s1696_s29 }
 0x4f6   : > { %p1698_p12 = pnand %p1697_p11, %p1854_p5  ;;  %p1705_p2 = por %p1704_p1, %p1703_p0 }
 0x4f8   : > { %p1699_p13 = pneg %p1698_p12 }
 0x4fa   : > { %p1706_p3 = pnand %p1705_p2, %p1699_p13 }
 0x554   : > { %v1008_v32 = vpop.permute.xlu1 %1007 }
 0x555   : > { %v1016_v34 = vmax.f32 %v999_v17, %v1008_v32 }
 0x557   : > { %1386 = vmatmul.mubr.msk.f32.vlgmr.msra.gmra.mrb[6].mxu1 %vm1051_vm5, %v1016_v34 }
 0x561   : > { %v1690_v35 = vpop.permute.xlu0 %1689 }
 0x562   : > { %v1692_v36 = vunpack.i.h.bf16 %v1690_v35  ;;  %v1691_v37 = vunpack.i.l.bf16 %v1690_v35 }
 0x564   : > { %v1009_v39 = vsel %vm315_vm2, %v1692_v36, %v1691_v37  ;;  %v1010_v48 = vsel %vm315_vm2, %v1691_v37, %v1008_v32 }
 0x565   : > { %v1014_v33 = vmax.f32 %v997_v29, %v1009_v39  ;;  %v1015_v40 = vmax.f32 %v998_v30, %v1010_v48 }
 0x567   : > { %1123 = vmatprep.mubr.f32.mxu0 %v1015_v40 }
 0x568   : > { %1124 = vmatmul.mubr.f32.vlgmr.msra.gmra.mrb[2].mxu0 %v1014_v33 }
 0x62a   : > { %v1195_v1 = vpop.f32.mrb[6].mxu1 }
 0x62b   : > { %v1387_v38 = vpop.f32.mrb[7].mxu1 }
 0x63b   : > { %v1341_v41 = vpop.f32.mrb[2].mxu0 }
 0x63c   : > { %v1342_v42 = vpop.f32.mrb[3].mxu0 }
 0x63d   : > { %v1343_v43 = vadd.f32 %v1342_v42, %v1341_v41 }
 0x63f   : > { %v1196_v44 = vadd.f32 %v1343_v43, %v1195_v1 }
 0x641   : > { %1200 = vst.msk [vmem:[%s271_s14] sm:$0xff] %vm1199_vm0, %v1196_v44 }
 0x642   : > { %1709 = shalt.err (!%p1706_p3)
}
 0x643   : > { %s1710_s15 = scalar_lea.hbm %s2190_s20, 128  ;;  %s1714_s17 = scalar_lea.hbm %s2239_s7, 256 }
 0x644   : > { %p1711_p4 = scmp.ne.s32.totalorder %s2190_s20, %s1710_s15  ;;  %p1715_p9 = scmp.lt.u32.totalorder %s2190_s20, %s2239_s7 }
 0x645   : > { %p1716_p10 = scmp.lt.u32.totalorder %s1714_s17, %s1710_s15  ;;  %p1718_p12 = scmp.lt.u32.totalorder %s1710_s15, %s2190_s20 }
 0x646   : > { %p1712_p7 = pnand %p1711_p4, %p1854_p5 }
 0x647   : > { %p1717_p11 = por %p1716_p10, %p1715_p9 }
 0x648   : > { %p1713_p8 = pneg %p1712_p7 }
 0x649   : > { %p1719_p13 = por %p1718_p12, %p1717_p11 }
 0x64b   : > { %p1720_p0 = pnand %p1719_p13, %p1713_p8 }
 0x64d   : > { %1723 = shalt.err (!%p1720_p0)
}
 0x64e   : > { %1467 = dma.vmem_to_hbm [thread:$0]  (%p1854_p5), %s2192_s18, 128, %s2190_s20, %s1202_s23  }
 0x64f PF: > { %p1473_p1 = scmp.ge.s32.totalorder %s1758_s27, 2  ;;  %s1227_s21 = sand.u32 1, %s1746_s24  }
 0x650   : > { %s1228_s22 = scalar_lea.sflag [#allocation4], %s1227_s21 }
 0x651   : > { %p1470_p2 = pnand %p1473_p1, %p1858_p6 }
 0x653   : > { %1741 = dma.done.wait (!%p1470_p2), %s1228_s22, 128  }
 0x654   : > { %1743 = vsyncadd (!%p1470_p2), %s1228_s22, 4294967168  ;;  %p17_p3 = scmp.ge.s32.totalorder %s1841_s30, 4   ;;  %s2242_s24 = smov %s1750_s25 }
 0x655   : > { %s2243_s25 = smov %s1754_s26  ;;  %s2244_s26 = smov %s1852_s10 }
 0x656   : > { %s2245_s27 = smov %s1841_s30  ;;  %19 = sbr.rel (!%p17_p3) target bundleno = 3 (0x3), region = 83 }
 0x65d   :  { %1233 = vsyncpa [#allocation4], 1 }
 0x65e   :  { %1235 = vsyncpa [#allocation4 + $0x1], 1 }

</bundles_post_ra>
